<compile_context>
chip_gen: v7x
topology: tpu7x:2x2x1
jax: 0.10.0
libtpu: 0.0.40
codegen_flags: <defaults>
</compile_context>

<pallas_src>
import numpy as np
import jax
import jax.numpy as jnp
from jax import lax
from jax.experimental import pallas as pl
from jax.experimental.pallas import tpu as pltpu


_TC = 8                  # time rows folded per inner step (sublane granularity)
_TU_TILE = 128           # window-tile height (output sublanes) for large Tu
_TD = 128                # feature tile (lanes)
_T_BLOCK_MAX = 1024      # max time rows per grid step -> T-independent VMEM footprint
_BIG = 2 ** 30           # assumes |window id| << 2**30
_MASK_ID = -(2 ** 30)    # sentinel id for masked / padded rows: never equals a real id


def _round_up(n, m):
    return ((n + m - 1) // m) * m


def _make_kernel(T_pad, T_block, TU_tile, n_u_tiles):
    """Builds the kernel with all tiling constants baked in as Python ints."""
    n_sub = T_block // _TC            # 8-row chunks per grid T step
    n8 = T_pad // _TC                 # 8-row chunks per batch row (flat SMEM stride)

    def kernel(twmin_s, tw_s, cmin_s, cmax_s, x_ref, floor_ref, o_ref):
        b = pl.program_id(0)
        t_blk = pl.program_id(2)

        # First T step for this (b, d): seed the resident output block with the
        # per-window floor (0 normally, -inf when every time step matches).
        @pl.when(t_blk == 0)
        def _init():
            o_ref[0] = jnp.broadcast_to(floor_ref[0], o_ref.shape[1:])

        tw_min_b = twmin_s[b]
        chunk_base = b * n8 + t_blk * n_sub
        row_base = b * T_pad + t_blk * T_block
        u_iota = lax.broadcasted_iota(jnp.int32, (TU_tile, 1), 0)

        def sub_body(s, carry):
            # Window-id range present in this 8-row chunk (valid rows only).
            cmin = cmin_s[chunk_base + s]
            cmax = cmax_s[chunk_base + s]
            r0 = pl.multiple_of(s * _TC, _TC)

            # TODO(synk): for very large Tu (hundreds of tiles) turn this static
            # unroll into a fori_loop over tiles with dynamic output slabs.
            for ut in range(n_u_tiles):
                lo = tw_min_b + ut * TU_tile            # first window id of this tile
                hi = lo + (TU_tile - 1)

                @pl.when(jnp.logical_and(cmin <= hi, cmax >= lo))
                def _process(lo=lo, ut=ut):
                    twu = lo + u_iota                                   # (TU_tile, 1)
                    xc = x_ref[0, pl.ds(r0, _TC), :]                    # (8, TD)
                    slab = o_ref[0, ut * TU_tile:(ut + 1) * TU_tile, :]
                    for i in range(_TC):                                # static unroll
                        twi = tw_s[row_base + s * _TC + i]              # scalar id (SMEM)
                        m = twu == twi                                  # (TU_tile, 1)
                        cand = jnp.where(m, xc[i:i + 1, :], -jnp.inf)   # (TU_tile, TD)
                        slab = jnp.maximum(slab, cand)
                    o_ref[0, ut * TU_tile:(ut + 1) * TU_tile, :] = slab
            return carry

        lax.fori_loop(0, n_sub, sub_body, 0)

    return kernel


def time_window_pooling(x, tw, mask, *, tu_max=None):
    """JAX/Pallas equivalent of TimeWindowPooling.forward(x, tw, mask).

    x: (B, T, D) float, tw: (B, T, 1) window index per step, mask: (B, T, 1) bool.
    Returns (B, Tu, D) with Tu = max_b (tw_max[b] - tw_min[b] + 1), or Tu = tu_max
    if given (static bound -> no host sync, fully jit-able).
    """
    x = jnp.asarray(x)
    if x.dtype not in (jnp.float32, jnp.bfloat16):
        x = x.astype(jnp.float32)
    B, T, D = x.shape

    tw_f = jnp.asarray(tw, jnp.float32).reshape(B, T)
    valid = jnp.asarray(mask).astype(bool).reshape(B, T)

    # TODO(synk): assumes tw holds integer-valued window indices (the torch
    # reference only ever matches them against arange(tw_min, tw_max + 1)).
    tw_i = jnp.round(tw_f).astype(jnp.int32)

    any_valid = jnp.any(valid, axis=1)
    tw_min = jnp.min(jnp.where(valid, tw_i, _BIG), axis=1)
    tw_max = jnp.max(jnp.where(valid, tw_i, -_BIG), axis=1)
    tw_min = jnp.where(any_valid, tw_min, 0).astype(jnp.int32)    # guard fully-masked rows
    tw_max = jnp.where(any_valid, tw_max, -1).astype(jnp.int32)
    counts = tw_max - tw_min + 1                                  # windows per batch (>= 0)

    if tu_max is None:
        # Single scalar device->host sync (mirrors the .cpu() in the torch
        # forward, but ships one int instead of the whole tw/mask tensors).
        Tu = max(int(jax.device_get(jnp.max(counts))), 1)
    else:
        Tu = max(int(tu_max), 1)

    # ---- static tiling ----
    TU_tile = _TU_TILE if Tu >= _TU_TILE else _round_up(Tu, 8)
    n_u_tiles = (Tu + TU_tile - 1) // TU_tile
    Tu_pad = n_u_tiles * TU_tile

    TD = _TD
    D_pad = _round_up(D, TD)

    T8 = _round_up(T, _TC)
    T_block = T8 if T8 <= _T_BLOCK_MAX else _T_BLOCK_MAX
    T_pad = _round_up(T8, T_block)
    n_t = T_pad // T_block
    n8 = T_pad // _TC

    # ---- padded / repacked operands ----
    x_p = x
    if (T_pad, D_pad) != (T, D):
        x_p = jnp.pad(x, ((0, 0), (0, T_pad - T), (0, D_pad - D)))

    # Per-row window ids with sentinel on masked / padded rows.  Sent to SMEM
    # via scalar prefetch instead of a lane-width-1 VMEM stream.
    # TODO(synk): for very long sequences (B*T_pad beyond a few hundred KB of
    # int32) repack these lane-dense into VMEM instead of SMEM.
    tw_row = jnp.where(valid, tw_i, _MASK_ID)
    if T_pad != T:
        tw_row = jnp.pad(tw_row, ((0, 0), (0, T_pad - T)), constant_values=_MASK_ID)
    tw_flat = tw_row.reshape(-1)

    # Per-8-row-chunk id range over valid rows only -> lets the kernel skip
    # chunks that cannot match a given window tile.
    tw_chunk = tw_row.reshape(B, n8, _TC)
    is_valid = tw_chunk != _MASK_ID
    cmin = jnp.min(jnp.where(is_valid, tw_chunk, _BIG), axis=-1).reshape(-1)
    cmax = jnp.max(jnp.where(is_valid, tw_chunk, -_BIG), axis=-1).reshape(-1)

    # Per-window floor: torch's where(match, x, 0).amax(dim=1) floors every
    # window at 0 unless *every* time step matches it (then the true, possibly
    # negative, max survives).  Windows with no match (incl. padded rows) -> 0.
    u_bins = jnp.clip(jnp.where(valid, tw_i - tw_min[:, None], Tu_pad), 0, Tu_pad)
    cnt = jnp.zeros((B, Tu_pad + 1), jnp.int32)
    cnt = cnt.at[jnp.arange(B)[:, None], u_bins].add(1)[:, :Tu_pad]
    matched_all = cnt == T
    floor = jnp.where(matched_all, -jnp.inf, 0.0).astype(x_p.dtype)[:, :, None]

    grid = (B, D_pad // TD, n_t)
    kernel = _make_kernel(T_pad=T_pad, T_block=T_block, TU_tile=TU_tile,
                          n_u_tiles=n_u_tiles)

    grid_spec = pltpu.PrefetchScalarGridSpec(
        num_scalar_prefetch=4,
        grid=grid,
        in_specs=[
            pl.BlockSpec((1, T_block, TD),
                         lambda b, d, t, s0, s1, s2, s3: (b, t, d)),    # x
            pl.BlockSpec((1, Tu_pad, 1),
                         lambda b, d, t, s0, s1, s2, s3: (b, 0, 0)),    # floor
        ],
        out_specs=pl.BlockSpec((1, Tu_pad, TD),
                               lambda b, d, t, s0, s1, s2, s3: (b, 0, d)),
    )

    out = pl.pallas_call(
        kernel,
        out_shape=jax.ShapeDtypeStruct((B, Tu_pad, D_pad), x_p.dtype),
        grid_spec=grid_spec,
        compiler_params=pltpu.CompilerParams(
            dimension_semantics=("parallel", "parallel", "arbitrary"),
            vmem_limit_bytes=32 * 1024 * 1024,
        ),
    )(tw_min, tw_flat, cmin, cmax, x_p, floor)

    return out[:, :Tu, :D]


def _reference(x, tw, mask):
    """Pure-numpy replica of the torch forward (mw_pooling + tw_uniq build)."""
    x = np.asarray(x, np.float32)
    tw_np = np.asarray(tw, np.float32).copy()
    mask_np = np.asarray(mask, bool)
    tw_np[~mask_np] = np.nan                                     # never matches
    tw_max = np.nanmax(tw_np, axis=1).squeeze(-1)
    tw_min = np.nanmin(tw_np, axis=1).squeeze(-1)
    seqs = [np.arange(lo, hi + 1, dtype=np.float32) for lo, hi in zip(tw_min, tw_max)]
    Tu = max(len(s) for s in seqs)
    B = tw_np.shape[0]
    tw_uniq = np.full((B, Tu), -99.0, np.float32)
    for i, s in enumerate(seqs):
        tw_uniq[i, :len(s)] = s
    match = tw_np[:, :, 0:1] == tw_uniq[:, None, :]              # (B, T, Tu)
    h = np.where(match[..., None], x[:, :, None, :], 0.0)        # (B, T, Tu, D)
    return h.max(axis=1)                                         # (B, Tu, D)


if __name__ == "__main__":
    key = jax.random.PRNGKey(0)
    kx, kt, km = jax.random.split(key, 3)

    B, T, D = 2, 8, 32
    x = jax.random.normal(kx, (B, T, D), dtype=jnp.float32)
    tw = jax.random.randint(kt, (B, T, 1), 0, 4).astype(jnp.float32)
    mask = jax.random.bernoulli(km, 0.75, (B, T, 1))
    mask = mask.at[:, 0, :].set(True)      # at least one valid step per batch

    ref = _reference(x, tw, mask)

    # Default path (data-dependent Tu, one scalar host sync like torch's .cpu()).
    out = time_window_pooling(x, tw, mask)
    jax.block_until_ready(out)
    assert out.shape == ref.shape, (out.shape, ref.shape)
    assert np.allclose(np.asarray(out), ref, atol=1e-6), "mismatch vs reference"

    # Fully jit-able path with a static Tu bound (no host sync).
    tu_static = ref.shape[1]
    out_jit = jax.jit(
        lambda a, b_, c: time_window_pooling(a, b_, c, tu_max=tu_static))(x, tw, mask)
    jax.block_until_ready(out_jit)
    assert np.allclose(np.asarray(out_jit), ref, atol=1e-6), "jit path mismatch"

    print("KERNEL_OK")
</pallas_src>

<mosaic_0001>
module attributes {stable_mosaic.version = 11 : i64} {
  func.func @kernel(%arg0: i32, %arg1: i32, %arg2: i32, %arg3: memref<2xi32, #tpu.memory_space<smem>>, %arg4: memref<16xi32, #tpu.memory_space<smem>>, %arg5: memref<2xi32, #tpu.memory_space<smem>>, %arg6: memref<2xi32, #tpu.memory_space<smem>>, %arg7: memref<1x8x128xf32, #tpu.memory_space<vmem>>, %arg8: memref<1x8x1xf32, #tpu.memory_space<vmem>>, %arg9: memref<1x8x128xf32, #tpu.memory_space<vmem>>) attributes {dimension_semantics = [#tpu.dimension_semantics<parallel>, #tpu.dimension_semantics<parallel>, #tpu.dimension_semantics<arbitrary>], iteration_bounds = array<i64: 2, 1, 1>, scalar_prefetch = 4 : i64, scratch_operands = 0 : i64, tpu.core_type = #tpu.core_type<tc>, window_params = [{transform_indices = @transform_0, window_bounds = array<i64: 1, 8, 128>}, {transform_indices = @transform_1, window_bounds = array<i64: 1, 8, 1>}, {transform_indices = @transform_2, window_bounds = array<i64: 1, 8, 128>}]} {
    %c0_i32 = arith.constant 0 : i32
    %0 = arith.cmpi eq, %arg2, %c0_i32 : i32
    %1 = arith.extui %0 : i1 to i32
    %c0_i32_0 = arith.constant 0 : i32
    %2 = arith.cmpi ne, %1, %c0_i32_0 : i32
    scf.if %2 {
      %c0 = arith.constant 0 : index
      %c0_8 = arith.constant 0 : index
      %c0_9 = arith.constant 0 : index
      %27 = vector.load %arg8[%c0, %c0_8, %c0_9] : memref<1x8x1xf32, #tpu.memory_space<vmem>>, vector<1x8x1xf32>
      %28 = vector.shape_cast %27 : vector<1x8x1xf32> to vector<8x1xf32>
      %29 = vector.shape_cast %28 : vector<8x1xf32> to vector<8x1xf32>
      %30 = vector.broadcast %29 : vector<8x1xf32> to vector<8x128xf32>
      %c0_10 = arith.constant 0 : index
      %c0_11 = arith.constant 0 : index
      %c0_12 = arith.constant 0 : index
      %31 = vector.load %arg9[%c0_10, %c0_11, %c0_12] : memref<1x8x128xf32, #tpu.memory_space<vmem>>, vector<1x8x128xf32>
      %32 = vector.shape_cast %31 : vector<1x8x128xf32> to vector<8x128xf32>
      %33 = vector.shape_cast %30 : vector<8x128xf32> to vector<1x8x128xf32>
      tpu.vector_store %arg9[%c0_10, %c0_11, %c0_12], %33 {strides = array<i32>} : memref<1x8x128xf32, #tpu.memory_space<vmem>>, vector<1x8x128xf32>,
    } else {
    }
    %3 = arith.index_cast %arg0 : i32 to index
    %4 = memref.load %arg3[%3] : memref<2xi32, #tpu.memory_space<smem>>
    %c1_i32 = arith.constant 1 : i32
    %5 = arith.muli %arg0, %c1_i32 : i32
    %c1_i32_1 = arith.constant 1 : i32
    %6 = arith.muli %arg2, %c1_i32_1 : i32
    %7 = arith.addi %5, %6 : i32
    %c8_i32 = arith.constant 8 : i32
    %8 = arith.muli %arg0, %c8_i32 : i32
    %c8_i32_2 = arith.constant 8 : i32
    %9 = arith.muli %arg2, %c8_i32_2 : i32
    %10 = arith.addi %8, %9 : i32
    %11 = tpu.iota {dimensions = array<i32: 0>} : vector<8x1xi32>
    %c0_i32_3 = arith.constant 0 : i32
    %12 = arith.addi %7, %c0_i32_3 : i32
    %13 = arith.index_cast %12 : i32 to index
    %14 = memref.load %arg5[%13] : memref<2xi32, #tpu.memory_space<smem>>
    %15 = arith.addi %7, %c0_i32_3 : i32
    %16 = arith.index_cast %15 : i32 to index
    %17 = memref.load %arg6[%16] : memref<2xi32, #tpu.memory_space<smem>>
    %c8_i32_4 = arith.constant 8 : i32
    %18 = arith.muli %c0_i32_3, %c8_i32_4 : i32
    %19 = tpu.assume_multiple %18, 8 : i32
    %c0_i32_5 = arith.constant 0 : i32
    %20 = arith.addi %4, %c0_i32_5 : i32
    %c7_i32 = arith.constant 7 : i32
    %21 = arith.addi %20, %c7_i32 : i32
    %22 = arith.cmpi sle, %14, %21 : i32
    %23 = arith.cmpi sge, %17, %20 : i32
    %24 = arith.andi %22, %23 : i1
    %25 = arith.extui %24 : i1 to i32
    %c0_i32_6 = arith.constant 0 : i32
    %26 = arith.cmpi ne, %25, %c0_i32_6 : i32
    scf.if %26 {
      %27 = vector.broadcast %20 : i32 to vector<8x1xi32>
      %28 = arith.addi %27, %11 : vector<8x1xi32>
      %c0 = arith.constant 0 : index
      %29 = arith.index_cast %19 : i32 to index
      %c0_8 = arith.constant 0 : index
      %30 = vector.load %arg7[%c0, %29, %c0_8] : memref<1x8x128xf32, #tpu.memory_space<vmem>>, vector<1x8x128xf32>
      %31 = vector.shape_cast %30 : vector<1x8x128xf32> to vector<8x128xf32>
      %c0_9 = arith.constant 0 : index
      %c0_10 = arith.constant 0 : index
      %c0_11 = arith.constant 0 : index
      %32 = vector.load %arg9[%c0_9, %c0_10, %c0_11] : memref<1x8x128xf32, #tpu.memory_space<vmem>>, vector<1x8x128xf32>
      %33 = vector.shape_cast %32 : vector<1x8x128xf32> to vector<8x128xf32>
      %c8_i32_12 = arith.constant 8 : i32
      %34 = arith.muli %c0_i32_3, %c8_i32_12 : i32
      %35 = arith.addi %10, %34 : i32
      %c0_i32_13 = arith.constant 0 : i32
      %36 = arith.addi %35, %c0_i32_13 : i32
      %37 = arith.index_cast %36 : i32 to index
      %38 = memref.load %arg4[%37] : memref<16xi32, #tpu.memory_space<smem>>
      %39 = vector.broadcast %38 : i32 to vector<8x1xi32>
      %40 = arith.cmpi eq, %28, %39 : vector<8x1xi32>
      %41 = vector.extract_strided_slice %31 {offsets = [0, 0], sizes = [1, 128], strides = [1, 1]} : vector<8x128xf32> to vector<1x128xf32>
      %cst = arith.constant 0xFF800000 : f32
      %42 = vector.shape_cast %40 : vector<8x1xi1> to vector<8x1xi1>
      %43 = vector.broadcast %42 : vector<8x1xi1> to vector<8x128xi1>
      %44 = vector.shape_cast %41 : vector<1x128xf32> to vector<1x128xf32>
      %45 = vector.broadcast %44 : vector<1x128xf32> to vector<8x128xf32>
      %46 = vector.broadcast %cst : f32 to vector<8x128xf32>
      %47 = arith.select %43, %45, %46 : vector<8x128xi1>, vector<8x128xf32>
      %48 = arith.maximumf %33, %47 : vector<8x128xf32>
      %c8_i32_14 = arith.constant 8 : i32
      %49 = arith.muli %c0_i32_3, %c8_i32_14 : i32
      %50 = arith.addi %10, %49 : i32
      %c1_i32_15 = arith.constant 1 : i32
      %51 = arith.addi %50, %c1_i32_15 : i32
      %52 = arith.index_cast %51 : i32 to index
      %53 = memref.load %arg4[%52] : memref<16xi32, #tpu.memory_space<smem>>
      %54 = vector.broadcast %53 : i32 to vector<8x1xi32>
      %55 = arith.cmpi eq, %28, %54 : vector<8x1xi32>
      %56 = vector.extract_strided_slice %31 {offsets = [1, 0], sizes = [1, 128], strides = [1, 1]} : vector<8x128xf32> to vector<1x128xf32>
      %cst_16 = arith.constant 0xFF800000 : f32
      %57 = vector.shape_cast %55 : vector<8x1xi1> to vector<8x1xi1>
      %58 = vector.broadcast %57 : vector<8x1xi1> to vector<8x128xi1>
      %59 = vector.shape_cast %56 : vector<1x128xf32> to vector<1x128xf32>
      %60 = vector.broadcast %59 : vector<1x128xf32> to vector<8x128xf32>
      %61 = vector.broadcast %cst_16 : f32 to vector<8x128xf32>
      %62 = arith.select %58, %60, %61 : vector<8x128xi1>, vector<8x128xf32>
      %63 = arith.maximumf %48, %62 : vector<8x128xf32>
      %c8_i32_17 = arith.constant 8 : i32
      %64 = arith.muli %c0_i32_3, %c8_i32_17 : i32
      %65 = arith.addi %10, %64 : i32
      %c2_i32 = arith.constant 2 : i32
      %66 = arith.addi %65, %c2_i32 : i32
      %67 = arith.index_cast %66 : i32 to index
      %68 = memref.load %arg4[%67] : memref<16xi32, #tpu.memory_space<smem>>
      %69 = vector.broadcast %68 : i32 to vector<8x1xi32>
      %70 = arith.cmpi eq, %28, %69 : vector<8x1xi32>
      %71 = vector.extract_strided_slice %31 {offsets = [2, 0], sizes = [1, 128], strides = [1, 1]} : vector<8x128xf32> to vector<1x128xf32>
      %cst_18 = arith.constant 0xFF800000 : f32
      %72 = vector.shape_cast %70 : vector<8x1xi1> to vector<8x1xi1>
      %73 = vector.broadcast %72 : vector<8x1xi1> to vector<8x128xi1>
      %74 = vector.shape_cast %71 : vector<1x128xf32> to vector<1x128xf32>
      %75 = vector.broadcast %74 : vector<1x128xf32> to vector<8x128xf32>
      %76 = vector.broadcast %cst_18 : f32 to vector<8x128xf32>
      %77 = arith.select %73, %75, %76 : vector<8x128xi1>, vector<8x128xf32>
      %78 = arith.maximumf %63, %77 : vector<8x128xf32>
      %c8_i32_19 = arith.constant 8 : i32
      %79 = arith.muli %c0_i32_3, %c8_i32_19 : i32
      %80 = arith.addi %10, %79 : i32
      %c3_i32 = arith.constant 3 : i32
      %81 = arith.addi %80, %c3_i32 : i32
      %82 = arith.index_cast %81 : i32 to index
      %83 = memref.load %arg4[%82] : memref<16xi32, #tpu.memory_space<smem>>
      %84 = vector.broadcast %83 : i32 to vector<8x1xi32>
      %85 = arith.cmpi eq, %28, %84 : vector<8x1xi32>
      %86 = vector.extract_strided_slice %31 {offsets = [3, 0], sizes = [1, 128], strides = [1, 1]} : vector<8x128xf32> to vector<1x128xf32>
      %cst_20 = arith.constant 0xFF800000 : f32
      %87 = vector.shape_cast %85 : vector<8x1xi1> to vector<8x1xi1>
      %88 = vector.broadcast %87 : vector<8x1xi1> to vector<8x128xi1>
      %89 = vector.shape_cast %86 : vector<1x128xf32> to vector<1x128xf32>
      %90 = vector.broadcast %89 : vector<1x128xf32> to vector<8x128xf32>
      %91 = vector.broadcast %cst_20 : f32 to vector<8x128xf32>
      %92 = arith.select %88, %90, %91 : vector<8x128xi1>, vector<8x128xf32>
      %93 = arith.maximumf %78, %92 : vector<8x128xf32>
      %c8_i32_21 = arith.constant 8 : i32
      %94 = arith.muli %c0_i32_3, %c8_i32_21 : i32
      %95 = arith.addi %10, %94 : i32
      %c4_i32 = arith.constant 4 : i32
      %96 = arith.addi %95, %c4_i32 : i32
      %97 = arith.index_cast %96 : i32 to index
      %98 = memref.load %arg4[%97] : memref<16xi32, #tpu.memory_space<smem>>
      %99 = vector.broadcast %98 : i32 to vector<8x1xi32>
      %100 = arith.cmpi eq, %28, %99 : vector<8x1xi32>
      %101 = vector.extract_strided_slice %31 {offsets = [4, 0], sizes = [1, 128], strides = [1, 1]} : vector<8x128xf32> to vector<1x128xf32>
      %cst_22 = arith.constant 0xFF800000 : f32
      %102 = vector.shape_cast %100 : vector<8x1xi1> to vector<8x1xi1>
      %103 = vector.broadcast %102 : vector<8x1xi1> to vector<8x128xi1>
      %104 = vector.shape_cast %101 : vector<1x128xf32> to vector<1x128xf32>
      %105 = vector.broadcast %104 : vector<1x128xf32> to vector<8x128xf32>
      %106 = vector.broadcast %cst_22 : f32 to vector<8x128xf32>
      %107 = arith.select %103, %105, %106 : vector<8x128xi1>, vector<8x128xf32>
      %108 = arith.maximumf %93, %107 : vector<8x128xf32>
      %c8_i32_23 = arith.constant 8 : i32
      %109 = arith.muli %c0_i32_3, %c8_i32_23 : i32
      %110 = arith.addi %10, %109 : i32
      %c5_i32 = arith.constant 5 : i32
      %111 = arith.addi %110, %c5_i32 : i32
      %112 = arith.index_cast %111 : i32 to index
      %113 = memref.load %arg4[%112] : memref<16xi32, #tpu.memory_space<smem>>
      %114 = vector.broadcast %113 : i32 to vector<8x1xi32>
      %115 = arith.cmpi eq, %28, %114 : vector<8x1xi32>
      %116 = vector.extract_strided_slice %31 {offsets = [5, 0], sizes = [1, 128], strides = [1, 1]} : vector<8x128xf32> to vector<1x128xf32>
      %cst_24 = arith.constant 0xFF800000 : f32
      %117 = vector.shape_cast %115 : vector<8x1xi1> to vector<8x1xi1>
      %118 = vector.broadcast %117 : vector<8x1xi1> to vector<8x128xi1>
      %119 = vector.shape_cast %116 : vector<1x128xf32> to vector<1x128xf32>
      %120 = vector.broadcast %119 : vector<1x128xf32> to vector<8x128xf32>
      %121 = vector.broadcast %cst_24 : f32 to vector<8x128xf32>
      %122 = arith.select %118, %120, %121 : vector<8x128xi1>, vector<8x128xf32>
      %123 = arith.maximumf %108, %122 : vector<8x128xf32>
      %c8_i32_25 = arith.constant 8 : i32
      %124 = arith.muli %c0_i32_3, %c8_i32_25 : i32
      %125 = arith.addi %10, %124 : i32
      %c6_i32 = arith.constant 6 : i32
      %126 = arith.addi %125, %c6_i32 : i32
      %127 = arith.index_cast %126 : i32 to index
      %128 = memref.load %arg4[%127] : memref<16xi32, #tpu.memory_space<smem>>
      %129 = vector.broadcast %128 : i32 to vector<8x1xi32>
      %130 = arith.cmpi eq, %28, %129 : vector<8x1xi32>
      %131 = vector.extract_strided_slice %31 {offsets = [6, 0], sizes = [1, 128], strides = [1, 1]} : vector<8x128xf32> to vector<1x128xf32>
      %cst_26 = arith.constant 0xFF800000 : f32
      %132 = vector.shape_cast %130 : vector<8x1xi1> to vector<8x1xi1>
      %133 = vector.broadcast %132 : vector<8x1xi1> to vector<8x128xi1>
      %134 = vector.shape_cast %131 : vector<1x128xf32> to vector<1x128xf32>
      %135 = vector.broadcast %134 : vector<1x128xf32> to vector<8x128xf32>
      %136 = vector.broadcast %cst_26 : f32 to vector<8x128xf32>
      %137 = arith.select %133, %135, %136 : vector<8x128xi1>, vector<8x128xf32>
      %138 = arith.maximumf %123, %137 : vector<8x128xf32>
      %c8_i32_27 = arith.constant 8 : i32
      %139 = arith.muli %c0_i32_3, %c8_i32_27 : i32
      %140 = arith.addi %10, %139 : i32
      %c7_i32_28 = arith.constant 7 : i32
      %141 = arith.addi %140, %c7_i32_28 : i32
      %142 = arith.index_cast %141 : i32 to index
      %143 = memref.load %arg4[%142] : memref<16xi32, #tpu.memory_space<smem>>
      %144 = vector.broadcast %143 : i32 to vector<8x1xi32>
      %145 = arith.cmpi eq, %28, %144 : vector<8x1xi32>
      %146 = vector.extract_strided_slice %31 {offsets = [7, 0], sizes = [1, 128], strides = [1, 1]} : vector<8x128xf32> to vector<1x128xf32>
      %cst_29 = arith.constant 0xFF800000 : f32
      %147 = vector.shape_cast %145 : vector<8x1xi1> to vector<8x1xi1>
      %148 = vector.broadcast %147 : vector<8x1xi1> to vector<8x128xi1>
      %149 = vector.shape_cast %146 : vector<1x128xf32> to vector<1x128xf32>
      %150 = vector.broadcast %149 : vector<1x128xf32> to vector<8x128xf32>
      %151 = vector.broadcast %cst_29 : f32 to vector<8x128xf32>
      %152 = arith.select %148, %150, %151 : vector<8x128xi1>, vector<8x128xf32>
      %153 = arith.maximumf %138, %152 : vector<8x128xf32>
      %c0_30 = arith.constant 0 : index
      %c0_31 = arith.constant 0 : index
      %c0_32 = arith.constant 0 : index
      %154 = vector.load %arg9[%c0_30, %c0_31, %c0_32] : memref<1x8x128xf32, #tpu.memory_space<vmem>>, vector<1x8x128xf32>
      %155 = vector.shape_cast %154 : vector<1x8x128xf32> to vector<8x128xf32>
      %156 = vector.shape_cast %153 : vector<8x128xf32> to vector<1x8x128xf32>
      tpu.vector_store %arg9[%c0_30, %c0_31, %c0_32], %156 {strides = array<i32>} : memref<1x8x128xf32, #tpu.memory_space<vmem>>, vector<1x8x128xf32>,
    } else {
    }
    %c1_i32_7 = arith.constant 1 : i32
    return
  }
  func.func @transform_0(%arg0: i32, %arg1: i32, %arg2: i32, %arg3: memref<2xi32, #tpu.memory_space<smem>>, %arg4: memref<16xi32, #tpu.memory_space<smem>>, %arg5: memref<2xi32, #tpu.memory_space<smem>>, %arg6: memref<2xi32, #tpu.memory_space<smem>>) -> (i32, i32, i32) {
    %c0_i32 = arith.constant 0 : i32
    return %arg0, %arg2, %arg1 : i32, i32, i32
  }
  func.func @transform_1(%arg0: i32, %arg1: i32, %arg2: i32, %arg3: memref<2xi32, #tpu.memory_space<smem>>, %arg4: memref<16xi32, #tpu.memory_space<smem>>, %arg5: memref<2xi32, #tpu.memory_space<smem>>, %arg6: memref<2xi32, #tpu.memory_space<smem>>) -> (i32, i32, i32) {
    %c0_i32 = arith.constant 0 : i32
    %c0_i32_0 = arith.constant 0 : i32
    %c0_i32_1 = arith.constant 0 : i32
    return %arg0, %c0_i32, %c0_i32_0 : i32, i32, i32
  }
  func.func @transform_2(%arg0: i32, %arg1: i32, %arg2: i32, %arg3: memref<2xi32, #tpu.memory_space<smem>>, %arg4: memref<16xi32, #tpu.memory_space<smem>>, %arg5: memref<2xi32, #tpu.memory_space<smem>>, %arg6: memref<2xi32, #tpu.memory_space<smem>>) -> (i32, i32, i32) {
    %c0_i32 = arith.constant 0 : i32
    %c0_i32_0 = arith.constant 0 : i32
    return %arg0, %c0_i32, %arg1 : i32, i32, i32
  }
}

</mosaic_0001>

<bundles_post_ra>
// kernel: tpu_custom_call.1
= control target key start
LH: loop header
LB: loop body
LE: loop exit
PB: predicated region body
PF: predicated region fallthrough
CT: control target
= control target key end

     0   :  { %s864_s0 = inlined_call_operand.vmem [shape: s32[2], index: 0, kind: input, shape index: {}]   ;;  %s865_s4 = inlined_call_operand.vmem [shape: f32[2,8,128], index: 4, kind: input, shape index: {}]   ;;  %s866_s5 = inlined_call_operand.vmem [shape: f32[2,8,1], index: 5, kind: input, shape index: {}]   ;;  %s867_s6 = inlined_call_operand.hbm [shape: f32[2,8,128], index: 6, kind: output, shape index: {}]   ;;  %s868_s1 = inlined_call_operand.vmem [shape: s32[16], index: 1, kind: input, shape index: {}]   ;;  %s869_s2 = inlined_call_operand.vmem [shape: s32[2], index: 2, kind: input, shape index: {}]   ;;  %s870_s3 = inlined_call_operand.vmem [shape: s32[2], index: 3, kind: input, shape index: {}]  }
   0x1   :  { %s11_s23 = sshll.u32 %s864_s0, 4  ;;  %s15_s26 = sshll.u32 %s868_s1, 4  ;;  %s12_s23 = int_to_ptr.vmem [resolvable:$true] %s11_s23  ;;  %s16_s26 = int_to_ptr.vmem [resolvable:$true] %s15_s26 }
   0x2   :  { %s526_s27 = scalar_lea.vmem %s12_s23, 16  ;;  %p531_p1 = scmp.lt.s32.totalorder %s12_s23, %s12_s23 }
   0x3   :  { %p527_p0 = scmp.ne.s32.totalorder %s12_s23, %s526_s27  ;;  %p532_p2 = scmp.lt.s32.totalorder %s526_s27, %s526_s27 }
   0x5   :  { %p533_p3 = por %p532_p2, %p531_p1 }
   0x7   :  { %p534_p4 = pnand %p533_p3, %p527_p0 }
   0x9   :  { %537 = shalt.err (!%p534_p4)  }
   0xa   :  { %s656_s28 = smov [#allocation3]   ;;  %s538_s29 = scalar_lea.vmem %s16_s26, 16 }
   0xb   :  { %14 = dma.vmem_to_smem %s12_s23, 16, %s656_s28, [#allocation2] }
   0xc   :  { %p539_p5 = scmp.ne.s32.totalorder %s16_s26, %s538_s29  ;;  %p543_p6 = scmp.lt.s32.totalorder %s16_s26, %s16_s26 }
   0xd   :  { %p544_p7 = scmp.lt.s32.totalorder %s538_s29, %s538_s29 }
   0xf   :  { %p545_p8 = por %p544_p7, %p543_p6 }
  0x11   :  { %p546_p9 = pnand %p545_p8, %p539_p5 }
  0x13   :  { %549 = shalt.err (!%p546_p9)  }
  0x14   :  { %s657_s0 = smov [#allocation4]   ;;  %s19_s7 = sshll.u32 %s869_s2, 4  ;;  %s20_s7 = int_to_ptr.vmem [resolvable:$true] %s19_s7 }
  0x15   :  { %18 = dma.vmem_to_smem %s16_s26, 16, %s657_s0, [#allocation2] }
  0x16   :  { %s23_s10 = sshll.u32 %s870_s3, 4  ;;  %s550_s11 = scalar_lea.vmem %s20_s7, 16  ;;  %s24_s10 = int_to_ptr.vmem [resolvable:$true] %s23_s10 }
  0x17   :  { %p551_p10 = scmp.ne.s32.totalorder %s20_s7, %s550_s11  ;;  %p555_p11 = scmp.lt.s32.totalorder %s20_s7, %s20_s7 }
  0x18   :  { %p556_p12 = scmp.lt.s32.totalorder %s550_s11, %s550_s11 }
  0x1a   :  { %p557_p13 = por %p556_p12, %p555_p11 }
  0x1c   :  { %p558_p0 = pnand %p557_p13, %p551_p10 }
  0x1e   :  { %561 = shalt.err (!%p558_p0)  }
  0x1f   :  { %s658_s12 = smov [#allocation5]   ;;  %s562_s13 = scalar_lea.vmem %s24_s10, 16 }
  0x20   :  { %22 = dma.vmem_to_smem %s20_s7, 16, %s658_s12, [#allocation2] }
  0x21   :  { %p563_p1 = scmp.ne.s32.totalorder %s24_s10, %s562_s13  ;;  %p567_p2 = scmp.lt.s32.totalorder %s24_s10, %s24_s10 }
  0x22   :  { %p568_p3 = scmp.lt.s32.totalorder %s562_s13, %s562_s13 }
  0x24   :  { %p569_p4 = por %p568_p3, %p567_p2 }
  0x26   :  { %p570_p5 = pnand %p569_p4, %p563_p1 }
  0x28   :  { %573 = shalt.err (!%p570_p5)  }
  0x29   :  { %s659_s2 = smov [#allocation6]  }
  0x2a   :  { %26 = dma.vmem_to_smem %s24_s10, 16, %s659_s2, [#allocation2] }
  0x2b   :  { %626 = dma.done.wait [#allocation2], 64 }
  0x2c   :  { %627 = vsyncadd [#allocation2], 4294967232 }
  0x2d   :  { %28 = sfence }
  0x2e   :  { %29 = vsyncpa [#allocation8], 0 }
  0x2f   :  { %31 = vsyncpa [#allocation8 + $0x1], 0  ;;  %s709_s3 = smov 0   ;;  %s711_s14 = smov 0  }
  0x30   :  { %s713_s15 = smov 0   ;;  %s715_s16 = smov 0  }
  0x31   :  { %s717_s17 = smov 0   ;;  %s719_s18 = smov 0  }
  0x32 LB: > { %s452_s19 = sadd.s32 4294967295, %s654_s18   ;;  %s453_s20 = sadd.s32 4294967294, %s654_s18   ;;  %s654_s18 = sphi %s719_s18, %s37_s18   ;;  %s650_s17 = sphi %s717_s17, %s877_s17   ;;  %s646_s16 = sphi %s715_s16, %s876_s16   ;;  %s642_s15 = sphi %s713_s15, %s875_s15   ;;  %s638_s14 = sphi %s711_s14, %s874_s14   ;;  %s634_s3 = sphi %s709_s3, %s873_s3  }
  0x33   : > { %s56_s21 = sadd.s32 1, %s650_s17  ;;  %s121_s22 = sadd.s32 1, %s642_s15 }
  0x34   : > { %p58_p6 = scmp.ge.s32.totalorder %s56_s21, 2  ;;  %p131_p7 = scmp.ne.s32.totalorder %s642_s15, %s638_s14 }
  0x35   : > { %p132_p8 = scmp.eq.s32.totalorder %s452_s19, 1  ;;  %p137_p9 = scmp.ne.s32.totalorder %s638_s14, %s634_s3 }
  0x36   : > { %s879_s21 = smov (%p58_p6, %s56_s21), 0  ;;  %p138_p11 = scmp.eq.s32.totalorder %s453_s20, 1 }
  0x37   : > { %p749_p10 = por %p132_p8, %p131_p7  ;;  %s116_s24 = ssub.s32 %s650_s17, %s879_s21 }
  0x38   : > { %p456_p12 = scmp.ge.s32.totalorder %s654_s18, 1  ;;  %p119_p13 = scmp.eq.s32.totalorder %s116_s24, 0 }
  0x39   : > { %p756_p0 = por %p138_p11, %p137_p9  ;;  %p176_p1 = scmp.lt.s32.totalorder %s654_s18, 3 }
  0x3a   : > { %s762_s26 = scalar_select %p119_p13, %s642_s15, %s121_s22  }
  0x3b   : > { %p177_p2 = pnand %p456_p12, %p176_p1 }
  0x3c   : > { %p207_p3 = scmp.lt.s32.totalorder (!%p177_p2), %s646_s16, 1  ;;  %s766_s27 = sld [smem:[#allocation3 + %s646_s16]] (!%p177_p2)  ;;  %v660_v0 = vmov (!%p177_p2), 0   ;;  %v237_v1 = vlaneseq (!%p177_p2) }
  0x3d   : > { %180 = sbr.rel (%p177_p2) target bundleno = 250 (0xfa), region = 28  ;;  %525 = vset.pattern.permute.xlu0 (!%p177_p2), %v660_v0  ;;  %s239_s28 = sld [smem:[#allocation5 + %s646_s16]] (!%p177_p2) }
  0x3e   : > { %s240_s29 = sld [smem:[#allocation6 + %s646_s16]] (!%p177_p2)  ;;  %s779_s13 = sshll.u32 (!%p177_p2), %s646_s16, 3  ;;  %v781_v3 = vshrl.u32 (!%p177_p2), %v237_v1, 7 }
  0x3f   : > { %s204_s2 = sand.u32 (!%p177_p2), 1, %s638_s14  }
  0x40   : > { %s457_s19 = sshll.u32 (!%p177_p2), %s204_s2, 3 }
  0x41   : > { %s787_s20 = scalar_lea.vmem (!%p177_p2), [#allocation7], %s457_s19 }
  0x42   : > { %s241_s12 = sadd.s32 (!%p177_p2), 7, %s766_s27 }
  0x43   : > { %p242_p4 = scmp.le.s32.totalorder (!%p177_p2), %s239_s28, %s241_s12 }
  0x44   : > { %s208_s0 = scalar_select %p207_p3, %s646_s16, 1 }
  0x45   : > { %p243_p5 = scmp.ge.s32.totalorder %s240_s29, %s766_s27 }
  0x46   : > { %s458_s1 = sshll.u32 %s208_s0, 3 }
  0x47   : > { %s220_s8 = scalar_lea.vmem %s866_s5, %s458_s1  ;;  %s216_s11 = scalar_lea.vmem %s865_s4, %s458_s1 }
  0x48   : > { %v225_v2 = vld [vmem:[%s220_s8] sm:$0xff]  ;;  %p244_p6 = pnand %p243_p5, %p242_p4 }
  0x49   : > { %228 = vperm.xlu0 %525, %v225_v2   ;;  %v248_v5 = vstv (!%p244_p6), %s766_s27  ;;  %s252_s22 = sld [smem:[#allocation4 + %s779_s13]] (!%p244_p6)  ;;  %v259_v6 = vsub.s32 (!%p244_p6), 0, %v781_v3  ;;  %s263_s24 = sadd.s32 (!%p244_p6), 1, %s779_s13  ;;  %v250_v7 = vld [vmem:[%s216_s11] sm:$0xff] (!%p244_p6)  ;;  %v271_v8 = vsub.s32 (!%p244_p6), 1, %v781_v3  ;;  %v283_v9 = vsub.s32 (!%p244_p6), 2, %v781_v3 }
  0x4a   : > { %s264_s28 = sld [smem:[#allocation4 + %s263_s24]] (!%p244_p6)  ;;  %s275_s29 = sadd.s32 (!%p244_p6), 2, %s779_s13  ;;  %v249_v10 = vadd.s32 (!%p244_p6), %v248_v5, %v781_v3  ;;  %v295_v12 = vsub.s32 (!%p244_p6), 3, %v781_v3  ;;  %v307_v17 = vsub.s32 (!%p244_p6), 4, %v781_v3  ;;  %v319_v19 = vsub.s32 (!%p244_p6), 5, %v781_v3 }
  0x4b   : > { %s276_s0 = sld [smem:[#allocation4 + %s275_s29]] (!%p244_p6)  ;;  %s287_s1 = sadd.s32 (!%p244_p6), 3, %s779_s13  ;;  %v260_v11 = vrot.slane (!%p244_p6), %v250_v7, %v259_v6  ;;  %v272_v13 = vrot.slane (!%p244_p6), %v250_v7, %v271_v8  ;;  %v284_v16 = vrot.slane (!%p244_p6), %v250_v7, %v283_v9  ;;  %v331_v20 = vsub.s32 (!%p244_p6), 6, %v781_v3 }
  0x4c   : > { %s288_s27 = sld [smem:[#allocation4 + %s287_s1]] (!%p244_p6)  ;;  %s299_s30 = sadd.s32 (!%p244_p6), 4, %s779_s13  ;;  %v296_v23 = vrot.slane (!%p244_p6), %v250_v7, %v295_v12  ;;  %v308_v29 = vrot.slane (!%p244_p6), %v250_v7, %v307_v17  ;;  %v320_v33 = vrot.slane (!%p244_p6), %v250_v7, %v319_v19  ;;  %v343_v35 = vsub.s32 (!%p244_p6), 7, %v781_v3 }
  0x4d   : > { %s300_s7 = sld [smem:[#allocation4 + %s299_s30]] (!%p244_p6)  ;;  %s311_s8 = sadd.s32 (!%p244_p6), 5, %s779_s13  ;;  %v332_v38 = vrot.slane (!%p244_p6), %v250_v7, %v331_v20 }
  0x4e   : > { %s802_s9 = sld [smem:[#allocation4 + %s311_s8]] (!%p244_p6)  ;;  %s323_s10 = sadd.s32 (!%p244_p6), 6, %s779_s13  ;;  %v344_v42 = vrot.slane (!%p244_p6), %v250_v7, %v343_v35 }
  0x4f   : > { %v253_v15 = vstv (!%p244_p6), %s252_s22  ;;  %s807_s11 = sld [smem:[#allocation4 + %s323_s10]] (!%p244_p6)  ;;  %s335_s12 = sadd.s32 (!%p244_p6), 7, %s779_s13 }
  0x50   : > { %vm254_vm0 = vcmp.eq.s32.totalorder (!%p244_p6), %v249_v10, %v253_v15  ;;  %v265_v18 = vstv (!%p244_p6), %s264_s28  ;;  %s336_s19 = sld [smem:[#allocation4 + %s335_s12]] (!%p244_p6) }
  0x51   : > { %v261_v21 = vsel (!%p244_p6), %vm254_vm0, %v260_v11, -inf  ;;  %vm266_vm1 = vcmp.eq.s32.totalorder (!%p244_p6), %v249_v10, %v265_v18  ;;  %v277_v22 = vstv (!%p244_p6), %s276_s0 }
  0x52   : > { %v273_v25 = vsel (!%p244_p6), %vm266_vm1, %v272_v13, -inf  ;;  %vm278_vm2 = vcmp.eq.s32.totalorder (!%p244_p6), %v249_v10, %v277_v22  ;;  %v289_v26 = vstv (!%p244_p6), %s288_s27 }
  0x53   : > { %v285_v27 = vsel (!%p244_p6), %vm278_vm2, %v284_v16, -inf  ;;  %vm290_vm3 = vcmp.eq.s32.totalorder (!%p244_p6), %v249_v10, %v289_v26  ;;  %v301_v28 = vstv (!%p244_p6), %s300_s7 }
  0x54   : > { %vm302_vm4 = vcmp.eq.s32.totalorder (!%p244_p6), %v249_v10, %v301_v28  ;;  %v313_v31 = vstv (!%p244_p6), %s802_s9  ;;  %v297_v32 = vsel (!%p244_p6), %vm290_vm3, %v296_v23, -inf }
  0x55   : > { %v325_v34 = vstv (!%p244_p6), %s807_s11  ;;  %vm314_vm5 = vcmp.eq.s32.totalorder (!%p244_p6), %v249_v10, %v313_v31  ;;  %v309_v37 = vsel (!%p244_p6), %vm302_vm4, %v308_v29, -inf }
  0x56   : > { %v337_v39 = vstv (!%p244_p6), %s336_s19  ;;  %vm326_vm6 = vcmp.eq.s32.totalorder (!%p244_p6), %v249_v10, %v325_v34  ;;  %v321_v41 = vsel (!%p244_p6), %vm314_vm5, %v320_v33, -inf }
  0x57   : > { %vm338_vm7 = vcmp.eq.s32.totalorder (!%p244_p6), %v249_v10, %v337_v39  ;;  %v333_v44 = vsel (!%p244_p6), %vm326_vm6, %v332_v38, -inf }
  0x58   : > { %v345_v46 = vsel (!%p244_p6), %vm338_vm7, %v344_v42, -inf }
  0xc3   : > { %247 = sbr.rel (%p244_p6) target bundleno = 226 (0xe2), region = 36 }
  0xc8   : > { %v229_v4 = vpop.permute.xlu0 %228 }
  0xc9   : > { %231 = vst [vmem:[%s787_s20] sm:$0xff] %v229_v4 }
  0xd0   : > { %v251_v14 = vld [vmem:[%s787_s20] sm:$0xff] }
  0xd1   : > { %v262_v24 = vmax.f32 %v251_v14, %v261_v21 }
  0xd3   : > { %v274_v30 = vmax.f32 %v262_v24, %v273_v25 }
  0xd5   : > { %v286_v36 = vmax.f32 %v274_v30, %v285_v27 }
  0xd7   : > { %v298_v40 = vmax.f32 %v286_v36, %v297_v32 }
  0xd9   : > { %v310_v43 = vmax.f32 %v298_v40, %v309_v37 }
  0xdb   : > { %v322_v45 = vmax.f32 %v310_v43, %v321_v41 }
  0xdd   : > { %v334_v47 = vmax.f32 %v322_v45, %v333_v44 }
  0xdf   : > { %v346_v48 = vmax.f32 %v334_v47, %v345_v46 }
  0xe1   : > { %347 = vst [vmem:[%s787_s20] sm:$0xff] %v346_v48 }
  0xe2 PF: > { %s462_s13 = sshll.u32 %s646_s16, 7  ;;  %s363_s29 = sshll.u32 %s787_s20, 4  ;;  %s364_s29 = int_to_ptr.vmem [resolvable:$true] %s363_s29 }
  0xe3   : > { %s820_s28 = scalar_lea.hbm %s867_s6, %s462_s13  ;;  %s349_s0 = scalar_lea.sflag [#allocation8], %s204_s2 }
  0xe4   : > { %s574_s1 = scalar_lea.vmem %s364_s29, 128  ;;  %s661_s27 = smov [#allocation7]  }
  0xe5   : > { %p575_p7 = scmp.ne.s32.totalorder %s364_s29, %s574_s1  ;;  %s578_s30 = sshll.u32 %s661_s27, 4  ;;  %s579_s30 = int_to_ptr.vmem [resolvable:$false] %s578_s30 }
  0xe6   : > { %s580_s7 = scalar_lea.vmem %s579_s30, 256  ;;  %p581_p11 = scmp.lt.s32.totalorder %s364_s29, %s579_s30 }
  0xe7   : > { %p576_p8 = pnand %p575_p7, %p749_p10  ;;  %p582_p12 = scmp.lt.s32.totalorder %s580_s7, %s574_s1 }
  0xe9   : > { %p577_p9 = pneg %p576_p8  ;;  %p583_p13 = por %p582_p12, %p581_p11 }
  0xeb   : > { %p584_p1 = pnand %p583_p13, %p577_p9 }
  0xed   : > { %587 = shalt.err (!%p584_p1)
}
  0xee   : > { %s588_s16 = scalar_lea.hbm %s820_s28, 128  ;;  %s592_s8 = scalar_lea.hbm %s867_s6, 256 }
  0xef   : > { %p589_p2 = scmp.ne.s32.totalorder %s820_s28, %s588_s16  ;;  %p593_p5 = scmp.lt.u32.totalorder %s820_s28, %s867_s6 }
  0xf0   : > { %p594_p6 = scmp.lt.u32.totalorder %s592_s8, %s588_s16  ;;  %p596_p8 = scmp.lt.u32.totalorder %s588_s16, %s820_s28 }
  0xf1   : > { %p590_p3 = pnand %p589_p2, %p749_p10 }
  0xf2   : > { %p595_p7 = por %p594_p6, %p593_p5 }
  0xf3   : > { %p591_p4 = pneg %p590_p3 }
  0xf4   : > { %p597_p9 = por %p596_p8, %p595_p7 }
  0xf6   : > { %p598_p11 = pnand %p597_p9, %p591_p4 }
  0xf8   : > { %601 = shalt.err (!%p598_p11)
}
  0xf9   : > { %465 = dma.vmem_to_hbm [thread:$0]  (%p749_p10), %s364_s29, 128, %s820_s28, %s349_s0  }
  0xfa PF: > { %p471_p12 = scmp.ge.s32.totalorder %s654_s18, 2  ;;  %s375_s11 = sand.u32 1, %s634_s3  }
  0xfb   : > { %s376_s12 = scalar_lea.sflag [#allocation8], %s375_s11 }
  0xfc   : > { %p468_p13 = pnand %p471_p12, %p756_p0 }
  0xfe   : > { %629 = dma.done.wait (!%p468_p13), %s376_s12, 128  }
  0xff   : > { %631 = vsyncadd (!%p468_p13), %s376_s12, 4294967168  ;;  %s37_s18 = sadd.s32 1, %s654_s18   ;;  %s873_s3 = smov %s638_s14 }
 0x100   : > { %p34_p1 = scmp.ge.s32.totalorder %s37_s18, 4   ;;  %s874_s14 = smov %s642_s15 }
 0x101   : > { %s875_s15 = smov %s762_s26  ;;  %s876_s16 = smov %s650_s17 }
 0x102   : > { %s877_s17 = smov %s879_s21  ;;  %36 = sbr.rel (!%p34_p1) target bundleno = 50 (0x32), region = 74 }
 0x109   :  { %381 = vsyncpa [#allocation8], 1 }
 0x10a   :  { %383 = vsyncpa [#allocation8 + $0x1], 1 }

</bundles_post_ra>
